<compile_context>
chip_gen: v7x
topology: tpu7x:2x2x1
jax: 0.10.0
libtpu: 0.0.40
codegen_flags: <defaults>
</compile_context>

<pallas_src>
import functools

import jax
import jax.numpy as jnp
from jax.experimental import pallas as pl
from jax.experimental.pallas import tpu as pltpu


def _surname_kernel(u_ref,      # (T, BLK, H) f32, time-major pre-projected inputs (x@W_ih + b_ih + b_hh)
                    lens_ref,   # (BLK, 1) int32, sequence lengths (padded rows = 1)
                    whh_ref,    # (H, H) f32
                    w1_ref,     # (H, H) f32   (first MLP linear)
                    b1_ref,     # (1, H) f32
                    w2_ref,     # (H, C_pad) f32 (second MLP linear, lane-padded)
                    b2_ref,     # (1, C_pad) f32 (padded lanes = -1e30)
                    out_ref,    # (BLK, C_pad) f32
                    *, apply_softmax: bool):
    T, B, H = u_ref.shape

    w_hh = whh_ref[...]                                      # (H, H), resident across the loop
    lens_m1 = lens_ref[...] - 1                              # (B, 1) int32

    h = jnp.zeros((B, H), jnp.float32)
    gathered = jnp.zeros((B, H), jnp.float32)

    # Fully unrolled recurrence (T static & small). Only h @ W_hh + tanh sits on the
    # serial dependency chain; u_ref[t] is a contiguous per-step VMEM load (time-major),
    # and the column-gather compare/select is free filler under the MXU+tanh latency.
    for t in range(T):
        pre = u_ref[t] + jnp.dot(h, w_hh, preferred_element_type=jnp.float32)
        h = jnp.tanh(pre)                                    # (B, H)
        gathered = jnp.where(lens_m1 == t, h, gathered)      # keep h at position len-1

    # MLP head: Linear -> ReLU -> (Dropout: identity at inference) -> Linear
    hid = jnp.dot(gathered, w1_ref[...], preferred_element_type=jnp.float32) + b1_ref[...]
    hid = jnp.maximum(hid, 0.0)
    logits = jnp.dot(hid, w2_ref[...], preferred_element_type=jnp.float32) + b2_ref[...]

    if apply_softmax:
        # Padded lanes carry a -1e30 bias -> exp() == 0, so normalization is exact.
        m = jnp.max(logits, axis=1, keepdims=True)
        e = jnp.exp(logits - m)
        logits = e * pl.reciprocal(jnp.sum(e, axis=1, keepdims=True), approx=True)

    out_ref[...] = logits                                    # lane-dense (BLK, 128k) store


def surname_classifier_forward(params, x_in, x_lens=None, apply_softmax=False):
    """Forward pass matching SurnameClassifier.forward (eval mode)."""
    emb_table = params["emb"]                                # (n_embs, E)
    B, T = x_in.shape
    H = params["w_hh"].shape[0]
    C = params["w2"].shape[1]

    # Batch block: sublane-aligned; capped for VMEM portability (v7x: 64 MiB physical).
    BLK = min(8 * pl.cdiv(B, 8), 512)
    B_pad = BLK * pl.cdiv(B, BLK)
    C_pad = 128 * pl.cdiv(C, 128)

    # Fuse embedding lookup with the RNN input projection: the vocab is tiny, so this is
    # a one-time (n_embs, E) @ (E, H) matmul; the kernel never sees w_ih / b_ih / b_hh.
    u_table = (emb_table.astype(jnp.float32) @ params["w_ih"]
               + params["b_ih"] + params["b_hh"])            # (n_embs, H)

    # Pad token ids with padding_idx=0, gather pre-projected rows directly into the
    # time-major layout the kernel wants: (T, B_pad, H).
    if B_pad != B:
        x_in = jnp.pad(x_in, ((0, B_pad - B), (0, 0)))
    u = jnp.take(u_table, x_in.T, axis=0)                    # (T, B_pad, H)

    if x_lens is None:
        lens = jnp.full((B_pad, 1), T, dtype=jnp.int32)      # y_out[:, -1, :] case
    else:
        lens = jnp.clip(x_lens.astype(jnp.int32), 1, T).reshape(B, 1)
        if B_pad != B:
            lens = jnp.pad(lens, ((0, B_pad - B), (0, 0)), constant_values=1)

    # Lane-pad the final linear; padded logit lanes get a large negative bias so the
    # in-kernel softmax ignores them exactly.
    w2 = params["w2"]
    b2 = params["b2"]
    if C_pad != C:
        w2 = jnp.pad(w2, ((0, 0), (0, C_pad - C)))
        b2 = jnp.pad(b2, ((0, 0), (0, C_pad - C)), constant_values=-1e30)

    kernel = functools.partial(_surname_kernel, apply_softmax=apply_softmax)

    out = pl.pallas_call(
        kernel,
        out_shape=jax.ShapeDtypeStruct((B_pad, C_pad), jnp.float32),
        grid_spec=pltpu.PrefetchScalarGridSpec(
            num_scalar_prefetch=0,
            grid=(B_pad // BLK,),
            in_specs=[
                pl.BlockSpec((T, BLK, H), lambda i: (0, i, 0)),    # u (time-major)
                pl.BlockSpec((BLK, 1), lambda i: (i, 0)),          # lens
                pl.BlockSpec((H, H), lambda i: (0, 0)),            # w_hh (replicated)
                pl.BlockSpec((H, H), lambda i: (0, 0)),            # w1
                pl.BlockSpec((1, H), lambda i: (0, 0)),            # b1
                pl.BlockSpec((H, C_pad), lambda i: (0, 0)),        # w2
                pl.BlockSpec((1, C_pad), lambda i: (0, 0)),        # b2
            ],
            out_specs=pl.BlockSpec((BLK, C_pad), lambda i: (i, 0)),
        ),
        compiler_params=pltpu.CompilerParams(
            dimension_semantics=("parallel",)),                    # 2 TCs on v7x
    )(u, lens, params["w_hh"], params["w1"], params["b1"], w2, b2)

    return out[:B, :C]


def init_params(key, n_embs, emb_sz, rnn_hidden_sz, n_classes, padding_idx=0):
    ks = jax.random.split(key, 9)
    scale = 0.1
    emb = scale * jax.random.normal(ks[0], (n_embs, emb_sz), jnp.float32)
    emb = emb.at[padding_idx].set(0.0)                       # nn.Embedding padding_idx row
    params = {
        "emb":  emb,
        "w_ih": scale * jax.random.normal(ks[1], (emb_sz, rnn_hidden_sz), jnp.float32),
        "b_ih": scale * jax.random.normal(ks[2], (1, rnn_hidden_sz), jnp.float32),
        "w_hh": scale * jax.random.normal(ks[3], (rnn_hidden_sz, rnn_hidden_sz), jnp.float32),
        "b_hh": scale * jax.random.normal(ks[4], (1, rnn_hidden_sz), jnp.float32),
        "w1":   scale * jax.random.normal(ks[5], (rnn_hidden_sz, rnn_hidden_sz), jnp.float32),
        "b1":   scale * jax.random.normal(ks[6], (1, rnn_hidden_sz), jnp.float32),
        "w2":   scale * jax.random.normal(ks[7], (rnn_hidden_sz, n_classes), jnp.float32),
        "b2":   scale * jax.random.normal(ks[8], (1, n_classes), jnp.float32),
    }
    return params


if __name__ == "__main__":
    # Small shapes consistent with the module.
    B, T = 2, 8            # batch, sequence length
    n_embs = 20            # vocab size
    emb_sz = 32            # character embedding size
    rnn_hidden_sz = 32     # RNN hidden size
    n_classes = 18         # prediction vector size

    key = jax.random.PRNGKey(0)
    k_par, k_tok, k_len = jax.random.split(key, 3)

    params = init_params(k_par, n_embs, emb_sz, rnn_hidden_sz, n_classes)

    x_in = jax.random.randint(k_tok, (B, T), 1, n_embs, dtype=jnp.int32)   # token ids
    x_lens = jax.random.randint(k_len, (B,), 1, T + 1, dtype=jnp.int32)    # valid lengths in [1, T]

    logits = surname_classifier_forward(params, x_in, x_lens, apply_softmax=False)
    logits = jax.block_until_ready(logits)
    assert logits.shape == (B, n_classes)

    probs = surname_classifier_forward(params, x_in, x_lens, apply_softmax=True)
    probs = jax.block_until_ready(probs)
    assert probs.shape == (B, n_classes)

    # Also exercise the x_lens=None path (y_out[:, -1, :]).
    last = surname_classifier_forward(params, x_in, None, apply_softmax=False)
    last = jax.block_until_ready(last)
    assert last.shape == (B, n_classes)

    print("KERNEL_OK")
</pallas_src>

<mosaic_0001>
module attributes {stable_mosaic.version = 11 : i64} {
  func.func @_surname_kernel(%arg0: i32, %arg1: memref<8x8x32xf32, #tpu.memory_space<vmem>>, %arg2: memref<8x1xi32, #tpu.memory_space<vmem>>, %arg3: memref<32x32xf32, #tpu.memory_space<vmem>>, %arg4: memref<32x32xf32, #tpu.memory_space<vmem>>, %arg5: memref<1x32xf32, #tpu.memory_space<vmem>>, %arg6: memref<32x128xf32, #tpu.memory_space<vmem>>, %arg7: memref<1x128xf32, #tpu.memory_space<vmem>>, %arg8: memref<8x128xf32, #tpu.memory_space<vmem>>) attributes {dimension_semantics = [#tpu.dimension_semantics<parallel>], iteration_bounds = array<i64: 1>, scalar_prefetch = 0 : i64, scratch_operands = 0 : i64, tpu.core_type = #tpu.core_type<tc>, window_params = [{transform_indices = @transform_0, window_bounds = array<i64: 8, 8, 32>}, {transform_indices = @transform_1, window_bounds = array<i64: 8, 1>}, {pipeline_mode = #tpu.pipeline_mode<synchronous>, transform_indices = @transform_2, window_bounds = array<i64: 32, 32>}, {pipeline_mode = #tpu.pipeline_mode<synchronous>, transform_indices = @transform_3, window_bounds = array<i64: 32, 32>}, {pipeline_mode = #tpu.pipeline_mode<synchronous>, transform_indices = @transform_4, window_bounds = array<i64: 1, 32>}, {pipeline_mode = #tpu.pipeline_mode<synchronous>, transform_indices = @transform_5, window_bounds = array<i64: 32, 128>}, {pipeline_mode = #tpu.pipeline_mode<synchronous>, transform_indices = @transform_6, window_bounds = array<i64: 1, 128>}, {transform_indices = @transform_7, window_bounds = array<i64: 8, 128>}]} {
    %c0 = arith.constant 0 : index
    %c0_0 = arith.constant 0 : index
    %0 = vector.load %arg3[%c0, %c0_0] : memref<32x32xf32, #tpu.memory_space<vmem>>, vector<32x32xf32>
    %c0_1 = arith.constant 0 : index
    %c0_2 = arith.constant 0 : index
    %1 = vector.load %arg2[%c0_1, %c0_2] : memref<8x1xi32, #tpu.memory_space<vmem>>, vector<8x1xi32>
    %c1_i32 = arith.constant 1 : i32
    %2 = vector.broadcast %c1_i32 : i32 to vector<8x1xi32>
    %3 = arith.subi %1, %2 : vector<8x1xi32>
    %cst = arith.constant 0.000000e+00 : f32
    %4 = vector.broadcast %cst : f32 to vector<8x32xf32>
    %cst_3 = arith.constant 0.000000e+00 : f32
    %5 = vector.broadcast %cst_3 : f32 to vector<8x32xf32>
    %c0_4 = arith.constant 0 : index
    %c0_5 = arith.constant 0 : index
    %c0_6 = arith.constant 0 : index
    %6 = vector.load %arg1[%c0_4, %c0_5, %c0_6] : memref<8x8x32xf32, #tpu.memory_space<vmem>>, vector<1x8x32xf32>
    %7 = vector.shape_cast %6 : vector<1x8x32xf32> to vector<8x32xf32>
    %cst_7 = arith.constant dense<0.000000e+00> : vector<8x32xf32>
    %8 = tpu.matmul %4, %0, %cst_7 {dimension_numbers = #tpu.dot_dimension_numbers<[1], [0], [0], [1], [0, 0, 1, 1], [], []>} : vector<8x32xf32>, vector<32x32xf32>, vector<8x32xf32> -> vector<8x32xf32>
    %9 = arith.addf %7, %8 : vector<8x32xf32>
    %10 = math.tanh %9 : vector<8x32xf32>
    %c0_i32 = arith.constant 0 : i32
    %11 = vector.broadcast %c0_i32 : i32 to vector<8x1xi32>
    %12 = arith.cmpi eq, %3, %11 : vector<8x1xi32>
    %13 = vector.shape_cast %12 : vector<8x1xi1> to vector<8x1xi1>
    %14 = vector.broadcast %13 : vector<8x1xi1> to vector<8x32xi1>
    %15 = arith.select %14, %10, %5 : vector<8x32xi1>, vector<8x32xf32>
    %c1 = arith.constant 1 : index
    %c0_8 = arith.constant 0 : index
    %c0_9 = arith.constant 0 : index
    %16 = vector.load %arg1[%c1, %c0_8, %c0_9] : memref<8x8x32xf32, #tpu.memory_space<vmem>>, vector<1x8x32xf32>
    %17 = vector.shape_cast %16 : vector<1x8x32xf32> to vector<8x32xf32>
    %cst_10 = arith.constant dense<0.000000e+00> : vector<8x32xf32>
    %18 = tpu.matmul %10, %0, %cst_10 {dimension_numbers = #tpu.dot_dimension_numbers<[1], [0], [0], [1], [0, 0, 1, 1], [], []>} : vector<8x32xf32>, vector<32x32xf32>, vector<8x32xf32> -> vector<8x32xf32>
    %19 = arith.addf %17, %18 : vector<8x32xf32>
    %20 = math.tanh %19 : vector<8x32xf32>
    %c1_i32_11 = arith.constant 1 : i32
    %21 = vector.broadcast %c1_i32_11 : i32 to vector<8x1xi32>
    %22 = arith.cmpi eq, %3, %21 : vector<8x1xi32>
    %23 = vector.shape_cast %22 : vector<8x1xi1> to vector<8x1xi1>
    %24 = vector.broadcast %23 : vector<8x1xi1> to vector<8x32xi1>
    %25 = arith.select %24, %20, %15 : vector<8x32xi1>, vector<8x32xf32>
    %c2 = arith.constant 2 : index
    %c0_12 = arith.constant 0 : index
    %c0_13 = arith.constant 0 : index
    %26 = vector.load %arg1[%c2, %c0_12, %c0_13] : memref<8x8x32xf32, #tpu.memory_space<vmem>>, vector<1x8x32xf32>
    %27 = vector.shape_cast %26 : vector<1x8x32xf32> to vector<8x32xf32>
    %cst_14 = arith.constant dense<0.000000e+00> : vector<8x32xf32>
    %28 = tpu.matmul %20, %0, %cst_14 {dimension_numbers = #tpu.dot_dimension_numbers<[1], [0], [0], [1], [0, 0, 1, 1], [], []>} : vector<8x32xf32>, vector<32x32xf32>, vector<8x32xf32> -> vector<8x32xf32>
    %29 = arith.addf %27, %28 : vector<8x32xf32>
    %30 = math.tanh %29 : vector<8x32xf32>
    %c2_i32 = arith.constant 2 : i32
    %31 = vector.broadcast %c2_i32 : i32 to vector<8x1xi32>
    %32 = arith.cmpi eq, %3, %31 : vector<8x1xi32>
    %33 = vector.shape_cast %32 : vector<8x1xi1> to vector<8x1xi1>
    %34 = vector.broadcast %33 : vector<8x1xi1> to vector<8x32xi1>
    %35 = arith.select %34, %30, %25 : vector<8x32xi1>, vector<8x32xf32>
    %c3 = arith.constant 3 : index
    %c0_15 = arith.constant 0 : index
    %c0_16 = arith.constant 0 : index
    %36 = vector.load %arg1[%c3, %c0_15, %c0_16] : memref<8x8x32xf32, #tpu.memory_space<vmem>>, vector<1x8x32xf32>
    %37 = vector.shape_cast %36 : vector<1x8x32xf32> to vector<8x32xf32>
    %cst_17 = arith.constant dense<0.000000e+00> : vector<8x32xf32>
    %38 = tpu.matmul %30, %0, %cst_17 {dimension_numbers = #tpu.dot_dimension_numbers<[1], [0], [0], [1], [0, 0, 1, 1], [], []>} : vector<8x32xf32>, vector<32x32xf32>, vector<8x32xf32> -> vector<8x32xf32>
    %39 = arith.addf %37, %38 : vector<8x32xf32>
    %40 = math.tanh %39 : vector<8x32xf32>
    %c3_i32 = arith.constant 3 : i32
    %41 = vector.broadcast %c3_i32 : i32 to vector<8x1xi32>
    %42 = arith.cmpi eq, %3, %41 : vector<8x1xi32>
    %43 = vector.shape_cast %42 : vector<8x1xi1> to vector<8x1xi1>
    %44 = vector.broadcast %43 : vector<8x1xi1> to vector<8x32xi1>
    %45 = arith.select %44, %40, %35 : vector<8x32xi1>, vector<8x32xf32>
    %c4 = arith.constant 4 : index
    %c0_18 = arith.constant 0 : index
    %c0_19 = arith.constant 0 : index
    %46 = vector.load %arg1[%c4, %c0_18, %c0_19] : memref<8x8x32xf32, #tpu.memory_space<vmem>>, vector<1x8x32xf32>
    %47 = vector.shape_cast %46 : vector<1x8x32xf32> to vector<8x32xf32>
    %cst_20 = arith.constant dense<0.000000e+00> : vector<8x32xf32>
    %48 = tpu.matmul %40, %0, %cst_20 {dimension_numbers = #tpu.dot_dimension_numbers<[1], [0], [0], [1], [0, 0, 1, 1], [], []>} : vector<8x32xf32>, vector<32x32xf32>, vector<8x32xf32> -> vector<8x32xf32>
    %49 = arith.addf %47, %48 : vector<8x32xf32>
    %50 = math.tanh %49 : vector<8x32xf32>
    %c4_i32 = arith.constant 4 : i32
    %51 = vector.broadcast %c4_i32 : i32 to vector<8x1xi32>
    %52 = arith.cmpi eq, %3, %51 : vector<8x1xi32>
    %53 = vector.shape_cast %52 : vector<8x1xi1> to vector<8x1xi1>
    %54 = vector.broadcast %53 : vector<8x1xi1> to vector<8x32xi1>
    %55 = arith.select %54, %50, %45 : vector<8x32xi1>, vector<8x32xf32>
    %c5 = arith.constant 5 : index
    %c0_21 = arith.constant 0 : index
    %c0_22 = arith.constant 0 : index
    %56 = vector.load %arg1[%c5, %c0_21, %c0_22] : memref<8x8x32xf32, #tpu.memory_space<vmem>>, vector<1x8x32xf32>
    %57 = vector.shape_cast %56 : vector<1x8x32xf32> to vector<8x32xf32>
    %cst_23 = arith.constant dense<0.000000e+00> : vector<8x32xf32>
    %58 = tpu.matmul %50, %0, %cst_23 {dimension_numbers = #tpu.dot_dimension_numbers<[1], [0], [0], [1], [0, 0, 1, 1], [], []>} : vector<8x32xf32>, vector<32x32xf32>, vector<8x32xf32> -> vector<8x32xf32>
    %59 = arith.addf %57, %58 : vector<8x32xf32>
    %60 = math.tanh %59 : vector<8x32xf32>
    %c5_i32 = arith.constant 5 : i32
    %61 = vector.broadcast %c5_i32 : i32 to vector<8x1xi32>
    %62 = arith.cmpi eq, %3, %61 : vector<8x1xi32>
    %63 = vector.shape_cast %62 : vector<8x1xi1> to vector<8x1xi1>
    %64 = vector.broadcast %63 : vector<8x1xi1> to vector<8x32xi1>
    %65 = arith.select %64, %60, %55 : vector<8x32xi1>, vector<8x32xf32>
    %c6 = arith.constant 6 : index
    %c0_24 = arith.constant 0 : index
    %c0_25 = arith.constant 0 : index
    %66 = vector.load %arg1[%c6, %c0_24, %c0_25] : memref<8x8x32xf32, #tpu.memory_space<vmem>>, vector<1x8x32xf32>
    %67 = vector.shape_cast %66 : vector<1x8x32xf32> to vector<8x32xf32>
    %cst_26 = arith.constant dense<0.000000e+00> : vector<8x32xf32>
    %68 = tpu.matmul %60, %0, %cst_26 {dimension_numbers = #tpu.dot_dimension_numbers<[1], [0], [0], [1], [0, 0, 1, 1], [], []>} : vector<8x32xf32>, vector<32x32xf32>, vector<8x32xf32> -> vector<8x32xf32>
    %69 = arith.addf %67, %68 : vector<8x32xf32>
    %70 = math.tanh %69 : vector<8x32xf32>
    %c6_i32 = arith.constant 6 : i32
    %71 = vector.broadcast %c6_i32 : i32 to vector<8x1xi32>
    %72 = arith.cmpi eq, %3, %71 : vector<8x1xi32>
    %73 = vector.shape_cast %72 : vector<8x1xi1> to vector<8x1xi1>
    %74 = vector.broadcast %73 : vector<8x1xi1> to vector<8x32xi1>
    %75 = arith.select %74, %70, %65 : vector<8x32xi1>, vector<8x32xf32>
    %c7 = arith.constant 7 : index
    %c0_27 = arith.constant 0 : index
    %c0_28 = arith.constant 0 : index
    %76 = vector.load %arg1[%c7, %c0_27, %c0_28] : memref<8x8x32xf32, #tpu.memory_space<vmem>>, vector<1x8x32xf32>
    %77 = vector.shape_cast %76 : vector<1x8x32xf32> to vector<8x32xf32>
    %cst_29 = arith.constant dense<0.000000e+00> : vector<8x32xf32>
    %78 = tpu.matmul %70, %0, %cst_29 {dimension_numbers = #tpu.dot_dimension_numbers<[1], [0], [0], [1], [0, 0, 1, 1], [], []>} : vector<8x32xf32>, vector<32x32xf32>, vector<8x32xf32> -> vector<8x32xf32>
    %79 = arith.addf %77, %78 : vector<8x32xf32>
    %80 = math.tanh %79 : vector<8x32xf32>
    %c7_i32 = arith.constant 7 : i32
    %81 = vector.broadcast %c7_i32 : i32 to vector<8x1xi32>
    %82 = arith.cmpi eq, %3, %81 : vector<8x1xi32>
    %83 = vector.shape_cast %82 : vector<8x1xi1> to vector<8x1xi1>
    %84 = vector.broadcast %83 : vector<8x1xi1> to vector<8x32xi1>
    %85 = arith.select %84, %80, %75 : vector<8x32xi1>, vector<8x32xf32>
    %c0_30 = arith.constant 0 : index
    %c0_31 = arith.constant 0 : index
    %86 = vector.load %arg4[%c0_30, %c0_31] : memref<32x32xf32, #tpu.memory_space<vmem>>, vector<32x32xf32>
    %cst_32 = arith.constant dense<0.000000e+00> : vector<8x32xf32>
    %87 = tpu.matmul %85, %86, %cst_32 {dimension_numbers = #tpu.dot_dimension_numbers<[1], [0], [0], [1], [0, 0, 1, 1], [], []>} : vector<8x32xf32>, vector<32x32xf32>, vector<8x32xf32> -> vector<8x32xf32>
    %c0_33 = arith.constant 0 : index
    %c0_34 = arith.constant 0 : index
    %88 = vector.load %arg5[%c0_33, %c0_34] : memref<1x32xf32, #tpu.memory_space<vmem>>, vector<1x32xf32>
    %89 = vector.broadcast %88 : vector<1x32xf32> to vector<8x32xf32>
    %90 = arith.addf %87, %89 : vector<8x32xf32>
    %cst_35 = arith.constant 0.000000e+00 : f32
    %91 = vector.broadcast %cst_35 : f32 to vector<8x32xf32>
    %92 = arith.maximumf %90, %91 : vector<8x32xf32>
    %c0_36 = arith.constant 0 : index
    %c0_37 = arith.constant 0 : index
    %93 = vector.load %arg6[%c0_36, %c0_37] : memref<32x128xf32, #tpu.memory_space<vmem>>, vector<32x128xf32>
    %cst_38 = arith.constant dense<0.000000e+00> : vector<8x128xf32>
    %94 = tpu.matmul %92, %93, %cst_38 {dimension_numbers = #tpu.dot_dimension_numbers<[1], [0], [0], [1], [0, 0, 1, 1], [], []>} : vector<8x32xf32>, vector<32x128xf32>, vector<8x128xf32> -> vector<8x128xf32>
    %c0_39 = arith.constant 0 : index
    %c0_40 = arith.constant 0 : index
    %95 = vector.load %arg7[%c0_39, %c0_40] : memref<1x128xf32, #tpu.memory_space<vmem>>, vector<1x128xf32>
    %96 = vector.broadcast %95 : vector<1x128xf32> to vector<8x128xf32>
    %97 = arith.addf %94, %96 : vector<8x128xf32>
    %c0_41 = arith.constant 0 : index
    %c0_42 = arith.constant 0 : index
    %98 = vector.load %arg8[%c0_41, %c0_42] : memref<8x128xf32, #tpu.memory_space<vmem>>, vector<8x128xf32>
    tpu.vector_store %arg8[%c0_41, %c0_42], %97 {strides = array<i32>} : memref<8x128xf32, #tpu.memory_space<vmem>>, vector<8x128xf32>,
    return
  }
  func.func @transform_0(%arg0: i32) -> (i32, i32, i32) {
    %c0_i32 = arith.constant 0 : i32
    %c0_i32_0 = arith.constant 0 : i32
    %c0_i32_1 = arith.constant 0 : i32
    return %c0_i32, %arg0, %c0_i32_0 : i32, i32, i32
  }
  func.func @transform_1(%arg0: i32) -> (i32, i32) {
    %c0_i32 = arith.constant 0 : i32
    %c0_i32_0 = arith.constant 0 : i32
    return %arg0, %c0_i32 : i32, i32
  }
  func.func @transform_2(%arg0: i32) -> (i32, i32) {
    %c0_i32 = arith.constant 0 : i32
    %c0_i32_0 = arith.constant 0 : i32
    %c0_i32_1 = arith.constant 0 : i32
    return %c0_i32, %c0_i32_0 : i32, i32
  }
  func.func @transform_3(%arg0: i32) -> (i32, i32) {
    %c0_i32 = arith.constant 0 : i32
    %c0_i32_0 = arith.constant 0 : i32
    %c0_i32_1 = arith.constant 0 : i32
    return %c0_i32, %c0_i32_0 : i32, i32
  }
  func.func @transform_4(%arg0: i32) -> (i32, i32) {
    %c0_i32 = arith.constant 0 : i32
    %c0_i32_0 = arith.constant 0 : i32
    %c0_i32_1 = arith.constant 0 : i32
    return %c0_i32, %c0_i32_0 : i32, i32
  }
  func.func @transform_5(%arg0: i32) -> (i32, i32) {
    %c0_i32 = arith.constant 0 : i32
    %c0_i32_0 = arith.constant 0 : i32
    %c0_i32_1 = arith.constant 0 : i32
    return %c0_i32, %c0_i32_0 : i32, i32
  }
  func.func @transform_6(%arg0: i32) -> (i32, i32) {
    %c0_i32 = arith.constant 0 : i32
    %c0_i32_0 = arith.constant 0 : i32
    %c0_i32_1 = arith.constant 0 : i32
    return %c0_i32, %c0_i32_0 : i32, i32
  }
  func.func @transform_7(%arg0: i32) -> (i32, i32) {
    %c0_i32 = arith.constant 0 : i32
    %c0_i32_0 = arith.constant 0 : i32
    return %arg0, %c0_i32 : i32, i32
  }
}

</mosaic_0001>

<bundles_post_ra>
// kernel: tpu_custom_call.1
= control target key start
LH: loop header
LB: loop body
LE: loop exit
PB: predicated region body
PF: predicated region fallthrough
CT: control target
= control target key end

     0   :  { %12 = vsyncpa [#allocation3], 0  ;;  %s1562_s0 = inlined_call_operand.hbm [shape: f32[8,8,32], index: 0, kind: input, shape index: {}]   ;;  %s1563_s1 = inlined_call_operand.vmem [shape: s32[8,1], index: 1, kind: input, shape index: {}]   ;;  %s1564_s2 = inlined_call_operand.hbm [shape: f32[32,32], index: 2, kind: input, shape index: {}]   ;;  %s1565_s3 = inlined_call_operand.hbm [shape: f32[32,32], index: 3, kind: input, shape index: {}]   ;;  %s1566_s4 = inlined_call_operand.vmem [shape: f32[1,32], index: 4, kind: input, shape index: {}]   ;;  %s1567_s5 = inlined_call_operand.hbm [shape: f32[32,128], index: 5, kind: input, shape index: {}]   ;;  %s1568_s6 = inlined_call_operand.vmem [shape: f32[1,128], index: 6, kind: input, shape index: {}]   ;;  %s1569_s7 = inlined_call_operand.hbm [shape: f32[8,128], index: 7, kind: output, shape index: {}]  }
   0x1   :  { %13 = vsyncpa [#allocation6], 0 }
   0x2   :  { %14 = vsyncpa [#allocation9], 0 }
   0x3   :  { %15 = vsyncpa [#allocation4], 0  ;;  %s1326_s24 = smov [#allocation5]   ;;  %s1327_s26 = smov [#allocation2]  }
   0x4   :  { %s35_s25 = sshll.u32 %s1326_s24, 4  ;;  %s21_s27 = sshll.u32 %s1327_s26, 4  ;;  %s36_s25 = int_to_ptr.vmem [resolvable:$true] %s35_s25  ;;  %s1377_s27 = int_to_ptr.vmem [resolvable:$true] %s21_s27 }
   0x5   :  { %s1208_s30 = scalar_lea.hbm %s1564_s2, 512 }
   0x6   :  { %p1209_p0 = scmp.ne.s32.totalorder %s1564_s2, %s1208_s30  ;;  %p1212_p1 = scmp.lt.u32.totalorder %s1208_s30, %s1564_s2 }
   0x8   :  { %p1214_p2 = pnand %p1212_p1, %p1209_p0 }
   0xa   :  { %1217 = shalt.err (!%p1214_p2)
}
   0xb   :  { %s1218_s12 = scalar_lea.vmem %s36_s25, 512  ;;  %p1223_p4 = scmp.lt.s32.totalorder %s36_s25, %s36_s25 }
   0xc   :  { %p1219_p3 = scmp.ne.s32.totalorder %s36_s25, %s1218_s12  ;;  %p1224_p5 = scmp.lt.s32.totalorder %s1218_s12, %s1218_s12 }
   0xe   :  { %p1225_p6 = por %p1224_p5, %p1223_p4 }
  0x10   :  { %p1226_p7 = pnand %p1225_p6, %p1219_p3 }
  0x12   :  { %1229 = shalt.err (!%p1226_p7)
}
  0x13   :  { %s1328_s13 = smov 128   ;;  %s1329_s14 = smov 8  }
  0x14   :  { %41 = dma.hbm_to_vmem [thread:$0]  %s1564_s2, 512, %s36_s25, [#allocation6], %s1328_s13, %s1328_s13, %s1329_s14  }
  0x15   :  { %s1230_s19 = scalar_lea.hbm %s1562_s0, 1024 }
  0x16   :  { %p1231_p8 = scmp.ne.s32.totalorder %s1562_s0, %s1230_s19  ;;  %p1234_p9 = scmp.lt.u32.totalorder %s1230_s19, %s1562_s0 }
  0x18   :  { %p1236_p10 = pnand %p1234_p9, %p1231_p8 }
  0x1a   :  { %1239 = shalt.err (!%p1236_p10)
}
  0x1b   :  { %s1240_s24 = scalar_lea.vmem %s1377_s27, 1024  ;;  %p1245_p12 = scmp.lt.s32.totalorder %s1377_s27, %s1377_s27 }
  0x1c   :  { %p1241_p11 = scmp.ne.s32.totalorder %s1377_s27, %s1240_s24  ;;  %p1246_p13 = scmp.lt.s32.totalorder %s1240_s24, %s1240_s24 }
  0x1e   :  { %p1247_p0 = por %p1246_p13, %p1245_p12 }
  0x20   :  { %p1248_p1 = pnand %p1247_p0, %p1241_p11 }
  0x22   :  { %1251 = shalt.err (!%p1248_p1)
}
  0x23   :  { %27 = dma.hbm_to_vmem [thread:$0]  %s1562_s0, 1024, %s1377_s27, [#allocation3], %s1328_s13, %s1328_s13, %s1329_s14  }
  0x24   :  { %s1330_s26 = smov [#allocation7]   ;;  %s1331_s29 = smov [#allocation8]  }
  0x25   :  { %s47_s28 = sshll.u32 %s1330_s26, 4  ;;  %s61_s30 = sshll.u32 %s1331_s29, 4  ;;  %s48_s28 = int_to_ptr.vmem [resolvable:$true] %s47_s28  ;;  %s1414_s30 = int_to_ptr.vmem [resolvable:$true] %s61_s30 }
  0x26   :  { %s1252_s10 = scalar_lea.hbm %s1565_s3, 512 }
  0x27   :  { %p1253_p2 = scmp.ne.s32.totalorder %s1565_s3, %s1252_s10  ;;  %p1256_p3 = scmp.lt.u32.totalorder %s1252_s10, %s1565_s3 }
  0x29   :  { %p1258_p4 = pnand %p1256_p3, %p1253_p2 }
  0x2b   :  { %1261 = shalt.err (!%p1258_p4)
}
  0x2c   :  { %s1262_s0 = scalar_lea.vmem %s48_s28, 512  ;;  %p1267_p6 = scmp.lt.s32.totalorder %s48_s28, %s48_s28 }
  0x2d   :  { %p1263_p5 = scmp.ne.s32.totalorder %s48_s28, %s1262_s0  ;;  %p1268_p7 = scmp.lt.s32.totalorder %s1262_s0, %s1262_s0 }
  0x2f   :  { %p1269_p8 = por %p1268_p7, %p1267_p6 }
  0x31   :  { %p1270_p9 = pnand %p1269_p8, %p1263_p5 }
  0x33   :  { %1273 = shalt.err (!%p1270_p9)
}
  0x34   :  { %53 = dma.hbm_to_vmem [thread:$0]  %s1565_s3, 512, %s48_s28, [#allocation6], %s1328_s13, %s1328_s13, %s1329_s14  }
  0x35   :  { %s1274_s20 = scalar_lea.hbm %s1567_s5, 512 }
  0x36   :  { %p1275_p10 = scmp.ne.s32.totalorder %s1567_s5, %s1274_s20  ;;  %p1278_p11 = scmp.lt.u32.totalorder %s1274_s20, %s1567_s5 }
  0x38   :  { %p1280_p12 = pnand %p1278_p11, %p1275_p10 }
  0x3a   :  { %1283 = shalt.err (!%p1280_p12)
}
  0x3b   :  { %s1284_s2 = scalar_lea.vmem %s1414_s30, 512  ;;  %p1289_p0 = scmp.lt.s32.totalorder %s1414_s30, %s1414_s30 }
  0x3c   :  { %p1285_p13 = scmp.ne.s32.totalorder %s1414_s30, %s1284_s2  ;;  %p1290_p1 = scmp.lt.s32.totalorder %s1284_s2, %s1284_s2 }
  0x3e   :  { %p1291_p2 = por %p1290_p1, %p1289_p0 }
  0x40   :  { %p1292_p3 = pnand %p1291_p2, %p1285_p13 }
  0x42   :  { %1295 = shalt.err (!%p1292_p3)
}
  0x43   :  { %67 = dma.hbm_to_vmem [thread:$0]  %s1567_s5, 512, %s1414_s30, [#allocation9], %s1328_s13, %s1328_s13, %s1329_s14  }
  0x44   :  { %1318 = dma.done.wait [#allocation3], 1024  }
  0x45   :  { %1319 = vsyncadd [#allocation3], 4294966272 }
  0x46   :  { %1320 = dma.done.wait [#allocation6], 1024  }
  0x47   :  { %1321 = vsyncadd [#allocation6], 4294966272 }
  0x48   :  { %1322 = dma.done.wait [#allocation9], 512  }
  0x49   :  { %1323 = vsyncadd [#allocation9], 4294966784  ;;  %v1332_v0 = vmov 0.0|0.0   ;;  %vm1333_vm0 = vmmov 0   ;;  %v1334_v1 = vmov 0.0   ;;  %v1335_v2 = vmov 0  }
  0x4a   :  { %1119 = vmatprep.subr.bf16.mxu0 %v1332_v0  ;;  %1017 = vmatprep.mubr.msk.f32.mxu0 %vm1333_vm0, %v1334_v1  ;;  %v82_v3 = vld [vmem:[#allocation5] sm:$0xff]  ;;  %v83_v4 = vld [vmem:[#allocation5 + $0x8] sm:$0xff]  ;;  %v84_v5 = vld [vmem:[#allocation5 + $0x10] sm:$0xff]  ;;  %vm89_vm3 = vcmask 261120   ;;  %s1336_s29 = smov [#allocation10]  }
  0x4b   :  { %1190 = vset.pattern.permute.xlu0 %v1335_v2  ;;  %1125 = vmatprep.subr.bf16.mxu1 %v1332_v0  ;;  %v1459_v6 = vpack.c.bf16 %v83_v4, %v82_v3  ;;  %v85_v7 = vld [vmem:[#allocation5 + $0x18] sm:$0xff]  ;;  %v86_v8 = vld [vmem:[%s1563_s1] sm:$0xff]  ;;  %v173_v19 = vld [vmem:[#allocation2 + $0x8] sm:$0xff]  ;;  %s936_s30 = sshll.u32 %s1336_s29, 4  ;;  %s937_s30 = int_to_ptr.vmem [resolvable:$true] %s936_s30 }
  0x4c   :  { %1028 = vmatprep.mubr.msk.f32.mxu1 %vm1333_vm0, %v1334_v1  ;;  %1191 = vset.pattern.permute.xlu1 %v1335_v2  ;;  %v1464_v9 = vadd.s32 4294967295, %v86_v8  ;;  %v1467_v10 = vpack.c.bf16 %v85_v7, %v84_v5  ;;  %v88_v13 = vld [vmem:[#allocation2] sm:$0xff]  ;;  %v257_v29 = vld [vmem:[#allocation2 + $0x10] sm:$0xff]  ;;  %v341_v37 = vld [vmem:[#allocation2 + $0x18] sm:$0xff]  ;;  %s1296_s8 = scalar_lea.vmem %s937_s30, 128  ;;  %p1301_p5 = scmp.lt.s32.totalorder %s937_s30, %s937_s30 }
  0x4d   :  { %1121 = vmatpush3.bf16.msra.mxu0 %v1459_v6  ;;  %1127 = vmatpush3.bf16.msra.mxu1 %v1459_v6  ;;  %v425_v45 = vld [vmem:[#allocation2 + $0x20] sm:$0xff]  ;;  %v509_v53 = vld [vmem:[#allocation2 + $0x28] sm:$0xff]  ;;  %v593_v61 = vld [vmem:[#allocation2 + $0x30] sm:$0xff]  ;;  %p1297_p4 = scmp.ne.s32.totalorder %s937_s30, %s1296_s8  ;;  %p1302_p6 = scmp.lt.s32.totalorder %s1296_s8, %s1296_s8 }
  0x4e   :  { %1122 = vmatprep.subr.bf16.mxu0 %v1332_v0  ;;  %vm165_vm1 = vcmp.eq.s32.totalorder %v1464_v9, 0  ;;  %1128 = vmatprep.subr.bf16.mxu1 %v1332_v0  ;;  %vm249_vm2 = vcmp.eq.s32.totalorder %v1464_v9, 1  ;;  %vm333_vm4 = vcmp.eq.s32.totalorder %v1464_v9, 2  ;;  %vm417_vm7 = vcmp.eq.s32.totalorder %v1464_v9, 3  ;;  %v760_v7 = vld [vmem:[#allocation7] sm:$0xff]  ;;  %v761_v8 = vld [vmem:[#allocation7 + $0x8] sm:$0xff] }
  0x4f   :  { %v166_v11 = vsel %vm165_vm1, 1, %v1335_v2  ;;  %v250_v12 = vsel %vm249_vm2, 1, %v1335_v2  ;;  %v334_v18 = vsel %vm333_vm4, 1, %v1335_v2  ;;  %v418_v28 = vsel %vm417_vm7, 1, %v1335_v2  ;;  %p1303_p7 = por %p1302_p6, %p1301_p5 }
  0x50   :  { %168 = vperm.xlu0 %1190, %v166_v11   ;;  %336 = vperm.xlu1 %1191, %v334_v18   ;;  %vm501_vm9 = vcmp.eq.s32.totalorder %v1464_v9, 4  ;;  %vm585_vm11 = vcmp.eq.s32.totalorder %v1464_v9, 5  ;;  %vm669_vm13 = vcmp.eq.s32.totalorder %v1464_v9, 6  ;;  %vm753_vm15 = vcmp.eq.s32.totalorder %v1464_v9, 7  ;;  %v762_v9 = vld [vmem:[#allocation7 + $0x10] sm:$0xff] }
  0x51   :  { %1124 = vmatpush3.bf16.msra.mxu0 %v1467_v10  ;;  %1130 = vmatpush3.bf16.msra.mxu1 %v1467_v10  ;;  %v502_v36 = vsel %vm501_vm9, 1, %v1335_v2  ;;  %v586_v44 = vsel %vm585_vm11, 1, %v1335_v2  ;;  %v670_v52 = vsel %vm669_vm13, 1, %v1335_v2  ;;  %v754_v60 = vsel %vm753_vm15, 1, %v1335_v2  ;;  %v763_v2 = vld [vmem:[#allocation7 + $0x18] sm:$0xff]  ;;  %p1304_p8 = pnand %p1303_p7, %p1297_p4 }
  0x52   :  { %1131 = vmatprep.subr.bf16.mxu0 %v1332_v0  ;;  %1137 = vmatprep.subr.bf16.mxu1 %v1332_v0  ;;  %v1171_v11 = vpack.c.bf16 %v763_v2, %v762_v9 }
  0x54   :  { %1018 = vmatmul.mubr.f32.vlgmr.msra.gmra.mrb[0].mxu0 %v1334_v1  ;;  %252 = vperm.xlu0 %1190, %v250_v12   ;;  %v845_v12 = vld [vmem:[#allocation8] sm:$0xff] }
  0x55   :  { %1133 = vmatpush3.bf16.msra.mxu0 %v1459_v6  ;;  %1039 = vmatprep.mubr.msk.f32.mxu0 %vm1333_vm0, %v1334_v1 }
  0x56   :  { %1134 = vmatprep.subr.bf16.mxu0 %v1332_v0  ;;  %420 = vperm.xlu1 %1191, %v418_v28   ;;  %v957_v28 = vld [vmem:[%s1568_s6] ss:$0 sm:$0xff] }
  0x58   :  { %504 = vperm.xlu0 %1190, %v502_v36  }
  0x59   :  { %1136 = vmatpush3.bf16.msra.mxu0 %v1467_v10 }
  0x5a   :  { %1143 = vmatprep.subr.bf16.mxu0 %v1332_v0  ;;  %588 = vperm.xlu1 %1191, %v586_v44  }
  0x5c   :  { %672 = vperm.xlu0 %1190, %v670_v52  }
  0x5e   :  { %756 = vperm.xlu1 %1191, %v754_v60  }
  0xcf   :  { %v169_v23 = vpop.permute.xlu0 %168  ;;  %v337_v33 = vpop.permute.xlu1 %336 }
  0xd0   :  { %vm170_vm5 = vcmp.eq.s32.totalorder %v169_v23, 1  ;;  %vm338_vm8 = vcmp.eq.s32.totalorder %v337_v33, 1 }
  0xd3   :  { %v253_v24 = vpop.permute.xlu0 %252 }
  0xd4   :  { %vm254_vm6 = vcmp.eq.s32.totalorder %v253_v24, 1  ;;  %v955_v24 = vld [vmem:[%s1566_s4] ss:$0 sm:$0xff] }
  0xd5   :  { %v421_v41 = vpop.permute.xlu1 %420 }
  0xd6   :  { %vm422_vm10 = vcmp.eq.s32.totalorder %v421_v41, 1 }
  0xd7   :  { %v505_v49 = vpop.permute.xlu0 %504 }
  0xd8   :  { %vm506_vm12 = vcmp.eq.s32.totalorder %v505_v49, 1 }
  0xd9   :  { %v589_v57 = vpop.permute.xlu1 %588 }
  0xda   :  { %vm590_vm14 = vcmp.eq.s32.totalorder %v589_v57, 1 }
  0xdb   :  { %v673_v4 = vpop.permute.xlu0 %672 }
  0xdc   :  { %vm674_vm1 = vcmp.eq.s32.totalorder %v673_v4, 1 }
  0xdd   :  { %v757_v18 = vpop.permute.xlu1 %756 }
 0x127   :  { %v159_v14 = vpop.f32.mrb[0].mxu0 }
 0x128   :  { %v163_v15 = vadd.f32 %v159_v14, %v88_v13  ;;  %v1019_v16 = vpop.f32.mrb[1].mxu0  ;;  %v846_v13 = vld [vmem:[#allocation8 + $0x8] sm:$0xff] }
 0x129   :  { %v1174_v14 = vpack.c.bf16 %v846_v13, %v845_v12 }
 0x12a   :  { %1192 = vtanh.f32 %v163_v15  ;;  %v677_v15 = vld [vmem:[#allocation2 + $0x38] sm:$0xff] }
 0x134   :  { %v1193_v17 = vpop.eup %1192 }
 0x135   :  { %1029 = vmatmul.mubr.msk.f32.vlgmr.msra.gmra.mrb[0].mxu1 %vm89_vm3, %v1193_v17  ;;  %v171_v26 = vsel %vm170_vm5, %v1193_v17, 0.0 }
 0x136   :  { %1139 = vmatpush3.bf16.msra.mxu1 %v1459_v6  ;;  %1050 = vmatprep.mubr.msk.f32.mxu1 %vm1333_vm0, %v1334_v1 }
 0x137   :  { %1140 = vmatprep.subr.bf16.mxu1 %v1332_v0 }
 0x13a   :  { %1142 = vmatpush3.bf16.msra.mxu1 %v1467_v10 }
 0x13b   :  { %1149 = vmatprep.subr.bf16.mxu1 %v1332_v0 }
 0x208   :  { %v243_v20 = vpop.f32.mrb[0].mxu1 }
 0x209   :  { %v247_v21 = vadd.f32 %v243_v20, %v173_v19  ;;  %v1030_v22 = vpop.f32.mrb[1].mxu1 }
 0x20a   :  { %v848_v22 = vld [vmem:[#allocation8 + $0x18] sm:$0xff] }
 0x20b   :  { %1194 = vtanh.f32 %v247_v21  ;;  %v847_v21 = vld [vmem:[#allocation8 + $0x10] sm:$0xff] }
 0x20c   :  { %v1177_v23 = vpack.c.bf16 %v848_v22, %v847_v21 }
 0x215   :  { %v1195_v25 = vpop.eup %1194 }
 0x216   :  { %v255_v27 = vsel %vm254_vm6, %v1195_v25, %v171_v26  ;;  %1040 = vmatmul.mubr.msk.f32.vlgmr.msra.gmra.mrb[2].mxu0 %vm89_vm3, %v1195_v25 }
 0x217   :  { %1145 = vmatpush3.bf16.msra.mxu0 %v1459_v6  ;;  %1061 = vmatprep.mubr.msk.f32.mxu0 %vm1333_vm0, %v1334_v1 }
 0x218   :  { %1146 = vmatprep.subr.bf16.mxu0 %v1332_v0 }
 0x21b   :  { %1148 = vmatpush3.bf16.msra.mxu0 %v1467_v10 }
 0x21c   :  { %1155 = vmatprep.subr.bf16.mxu0 %v1332_v0 }
 0x2e9   :  { %v327_v30 = vpop.f32.mrb[2].mxu0 }
 0x2ea   :  { %v331_v31 = vadd.f32 %v327_v30, %v257_v29  ;;  %v1041_v32 = vpop.f32.mrb[3].mxu0 }
 0x2ec   :  { %1196 = vtanh.f32 %v331_v31 }
 0x2f6   :  { %v1197_v34 = vpop.eup %1196 }
 0x2f7   :  { %v339_v35 = vsel %vm338_vm8, %v1197_v34, %v255_v27  ;;  %1051 = vmatmul.mubr.msk.f32.vlgmr.msra.gmra.mrb[2].mxu1 %vm89_vm3, %v1197_v34 }
 0x2f8   :  { %1151 = vmatpush3.bf16.msra.mxu1 %v1459_v6  ;;  %1072 = vmatprep.mubr.msk.f32.mxu1 %vm1333_vm0, %v1334_v1 }
 0x2f9   :  { %1152 = vmatprep.subr.bf16.mxu1 %v1332_v0 }
 0x2fc   :  { %1154 = vmatpush3.bf16.msra.mxu1 %v1467_v10 }
 0x2fd   :  { %1161 = vmatprep.subr.bf16.mxu1 %v1332_v0 }
 0x3ca   :  { %v411_v38 = vpop.f32.mrb[2].mxu1 }
 0x3cb   :  { %v415_v39 = vadd.f32 %v411_v38, %v341_v37  ;;  %v1052_v40 = vpop.f32.mrb[3].mxu1 }
 0x3cd   :  { %1198 = vtanh.f32 %v415_v39 }
 0x3d7   :  { %v1199_v42 = vpop.eup %1198 }
 0x3d8   :  { %v423_v43 = vsel %vm422_vm10, %v1199_v42, %v339_v35  ;;  %1062 = vmatmul.mubr.msk.f32.vlgmr.msra.gmra.mrb[4].mxu0 %vm89_vm3, %v1199_v42 }
 0x3d9   :  { %1157 = vmatpush3.bf16.msra.mxu0 %v1459_v6  ;;  %1083 = vmatprep.mubr.msk.f32.mxu0 %vm1333_vm0, %v1334_v1 }
 0x3da   :  { %1158 = vmatprep.subr.bf16.mxu0 %v1332_v0 }
 0x3dd   :  { %1160 = vmatpush3.bf16.msra.mxu0 %v1467_v10 }
 0x3de   :  { %1167 = vmatprep.subr.bf16.mxu0 %v1332_v0 }
 0x4ab   :  { %v495_v46 = vpop.f32.mrb[4].mxu0 }
 0x4ac   :  { %v499_v47 = vadd.f32 %v495_v46, %v425_v45  ;;  %v1063_v48 = vpop.f32.mrb[5].mxu0 }
 0x4ae   :  { %1200 = vtanh.f32 %v499_v47 }
 0x4b8   :  { %v1201_v50 = vpop.eup %1200 }
 0x4b9   :  { %v507_v51 = vsel %vm506_vm12, %v1201_v50, %v423_v43  ;;  %1073 = vmatmul.mubr.msk.f32.vlgmr.msra.gmra.mrb[4].mxu1 %vm89_vm3, %v1201_v50 }
 0x4ba   :  { %1163 = vmatpush3.bf16.msra.mxu1 %v1459_v6  ;;  %1094 = vmatprep.mubr.msk.f32.mxu1 %vm1333_vm0, %v1334_v1 }
 0x4bb   :  { %1164 = vmatprep.subr.bf16.mxu1 %v1332_v0 }
 0x4be   :  { %1166 = vmatpush3.bf16.msra.mxu1 %v1467_v10  ;;  %v1168_v10 = vpack.c.bf16 %v761_v8, %v760_v7 }
 0x4bf   :  { %1173 = vmatprep.subr.bf16.mxu1 %v1332_v0 }
 0x58c   :  { %v579_v54 = vpop.f32.mrb[4].mxu1 }
 0x58d   :  { %v583_v55 = vadd.f32 %v579_v54, %v509_v53  ;;  %v1074_v56 = vpop.f32.mrb[5].mxu1 }
 0x58f   :  { %1202 = vtanh.f32 %v583_v55 }
 0x599   :  { %v1203_v58 = vpop.eup %1202 }
 0x59a   :  { %v591_v59 = vsel %vm590_vm14, %v1203_v58, %v507_v51  ;;  %1084 = vmatmul.mubr.msk.f32.vlgmr.msra.gmra.mrb[6].mxu0 %vm89_vm3, %v1203_v58 }
 0x59b   :  { %1105 = vmatprep.mubr.msk.f32.mxu0 %vm1333_vm0, %v1334_v1  ;;  %1169 = vmatpush3.bf16.msra.mxu0 %v1168_v10 }
 0x59c   :  { %1170 = vmatprep.subr.bf16.mxu0 %v1332_v0 }
 0x59f   :  { %1172 = vmatpush3.bf16.msra.mxu0 %v1171_v11 }
 0x66d   :  { %v663_v62 = vpop.f32.mrb[6].mxu0 }
 0x66e   :  { %v667_v63 = vadd.f32 %v663_v62, %v593_v61  ;;  %v1085_v3 = vpop.f32.mrb[7].mxu0 }
 0x670   :  { %1204 = vtanh.f32 %v667_v63 }
 0x67a   :  { %v1205_v5 = vpop.eup %1204 }
 0x67b   :  { %v675_v6 = vsel %vm674_vm1, %v1205_v5, %v591_v59  ;;  %1095 = vmatmul.mubr.msk.f32.vlgmr.msra.gmra.mrb[6].mxu1 %vm89_vm3, %v1205_v5 }
 0x67c   :  { %1116 = vmatprep.mubr.msk.f32.mxu1 %vm1333_vm0, %v1334_v1  ;;  %1175 = vmatpush3.bf16.msra.mxu1 %v1174_v14  ;;  %vm758_vm0 = vcmp.eq.s32.totalorder %v757_v18, 1 }
 0x67d   :  { %1176 = vmatprep.subr.bf16.mxu1 %v1332_v0 }
 0x680   :  { %1178 = vmatpush3.bf16.msra.mxu1 %v1177_v23 }
 0x74e   :  { %v747_v16 = vpop.f32.mrb[6].mxu1 }
 0x74f   :  { %v751_v17 = vadd.f32 %v747_v16, %v677_v15  ;;  %v1096_v1 = vpop.f32.mrb[7].mxu1 }
 0x751   :  { %1206 = vtanh.f32 %v751_v17 }
 0x75b   :  { %v1207_v19 = vpop.eup %1206 }
 0x75c   :  { %v759_v20 = vsel %vm758_vm0, %v1207_v19, %v675_v6 }
 0x75d   :  { %1106 = vmatmul.mubr.msk.f32.vlgmr.msra.gmra.mrb[8].mxu0 %vm89_vm3, %v759_v20 }
 0x830   :  { %v840_v0 = vpop.f32.mrb[8].mxu0 }
 0x831   :  { %v841_v25 = vadd.f32 %v955_v24, %v840_v0  ;;  %v1107_v26 = vpop.f32.mrb[9].mxu0 }
 0x833   :  { %v844_v27 = vmax.f32 %v841_v25, 0.0 }
 0x835   :  { %1117 = vmatmul.mubr.msk.f32.vlgmr.msra.gmra.mrb[8].mxu1 %vm89_vm3, %v844_v27 }
 0x908   :  { %v925_v29 = vpop.f32.mrb[8].mxu1 }
 0x909   :  { %v926_v30 = vadd.f32 %v957_v28, %v925_v29  ;;  %v1118_v31 = vpop.f32.mrb[9].mxu1 }
 0x90b   :  { %929 = vst [vmem:[#allocation10] sm:$0xff] %v926_v30 }
 0x90c   :  { %1307 = shalt.err (!%p1304_p8)
}
 0x90d   :  { %s1308_s10 = scalar_lea.hbm %s1569_s7, 128 }
 0x90e   :  { %p1309_p9 = scmp.ne.s32.totalorder %s1569_s7, %s1308_s10  ;;  %p1312_p10 = scmp.lt.u32.totalorder %s1308_s10, %s1569_s7 }
 0x910   :  { %p1314_p11 = pnand %p1312_p10, %p1309_p9 }
 0x912   :  { %1317 = shalt.err (!%p1314_p11)
}
 0x913   :  { %939 = dma.vmem_to_hbm [thread:$0]  %s937_s30, 128, %s1569_s7, [#allocation4]  }
 0x914   :  { %1324 = dma.done.wait [#allocation4], 128  }
 0x915   :  { %1325 = vsyncadd [#allocation4], 4294967168 }
 0x916   :  { %943 = vsyncpa [#allocation3], 1 }
 0x917   :  { %944 = vsyncpa [#allocation6], 1 }
 0x918   :  { %945 = vsyncpa [#allocation9], 1 }
 0x919   :  { %946 = vsyncpa [#allocation4], 1 }

</bundles_post_ra>
